<compile_context>
chip_gen: v7x
topology: tpu7x:2x2x1
jax: 0.10.0
libtpu: 0.0.40
codegen_flags: <defaults>
</compile_context>

<pallas_src>
import functools
import numpy as np

import jax
import jax.numpy as jnp
from jax import lax
from jax.experimental import pallas as pl
from jax.experimental.pallas import tpu as pltpu


# ----------------------- fused matmul + bias (+ReLU), row-tiled -----------------------

def _mm_bias_act_kernel(x_ref, w_ref, b_ref, o_ref, *, relu):
    y = jnp.dot(x_ref[...], w_ref[...], preferred_element_type=jnp.float32)
    y = y + b_ref[...]
    if relu:
        y = jnp.maximum(y, 0.0)
    o_ref[...] = y


def matmul_bias_act(x, w, b, *, relu, tm=512):
    """x:(R,K) bf16 @ w:(K,N) bf16 + b:(N,) f32 -> (R,N) f32. Row-tiled, parallel grid."""
    R, K = x.shape
    _, N = w.shape
    tm = min(tm, R)
    kern = functools.partial(_mm_bias_act_kernel, relu=relu)
    return pl.pallas_call(
        kern,
        out_shape=jax.ShapeDtypeStruct((R, N), jnp.float32),
        grid=(pl.cdiv(R, tm),),
        in_specs=[pl.BlockSpec((tm, K), lambda i: (i, 0)),
                  pl.BlockSpec((K, N), lambda i: (0, 0)),
                  pl.BlockSpec((1, N), lambda i: (0, 0))],
        out_specs=pl.BlockSpec((tm, N), lambda i: (i, 0)),
        compiler_params=pltpu.CompilerParams(dimension_semantics=("parallel",)),
    )(x, w, b.reshape(1, N))


# ------------------- recursive 3x3 conv: L steps fully inside one kernel -------------------

def _rec_conv_kernel(x_ref, w_ref, b_ref, o_ref, *, L):
    Bt, P, M = x_ref.shape                       # (Bt, 64, M)
    rows = Bt * P
    feat0 = x_ref[...].reshape(rows, M)          # f32 features, rows = flattened (b, y, x)

    # Static validity masks for the 9 taps of a zero-padded 3x3 conv on an 8x8 grid.
    # Row p -> (y, x) of its image; tap (di, dj) valid iff (y+di, x+dj) stays inside 8x8.
    ridx = lax.broadcasted_iota(jnp.int32, (rows, M), 0)
    r = ridx % P
    yy = r // 8
    xx = r % 8
    masks, shifts = [], []
    for k in range(9):
        di, dj = k // 3 - 1, k % 3 - 1
        yv, xv = yy + di, xx + dj
        masks.append((yv >= 0) & (yv < 8) & (xv >= 0) & (xv < 8))
        shifts.append(di * 8 + dj)               # flattened-row shift of that tap

    wcat = w_ref[...]                            # (9*M, M) bf16
    bias = b_ref[...]                            # (1, M)  f32

    def step(_, feat):
        parts = []
        for k in range(9):
            s = shifts[k]
            if s == 0:
                parts.append(feat)               # center tap: always valid
            else:
                # shifted[p] = feat[p + s]; rolls across image borders land only on masked rows.
                sh = pltpu.roll(feat, shift=(-s) % rows, axis=0)   # sublane rotate (XLU)
                parts.append(jnp.where(masks[k], sh, 0.0))
        cat = jnp.concatenate(parts, axis=-1)                      # (rows, 9*M)
        y = jnp.dot(cat.astype(jnp.bfloat16), wcat,
                    preferred_element_type=jnp.float32)            # single K=9M matmul
        return jnp.maximum(y + bias, 0.0)

    feat = lax.fori_loop(0, L, step, feat0)
    o_ref[...] = feat.reshape(Bt, P, M)


def recursive_conv(x, wcat, b, *, L, bt=8):
    """x: (B, 64, M) f32; wcat: (9*M, M) bf16; b: (M,) f32."""
    B, P, M = x.shape
    bt = min(bt, B)
    kern = functools.partial(_rec_conv_kernel, L=L)
    return pl.pallas_call(
        kern,
        out_shape=jax.ShapeDtypeStruct((B, P, M), jnp.float32),
        grid=(pl.cdiv(B, bt),),
        in_specs=[pl.BlockSpec((bt, P, M), lambda i: (i, 0, 0)),
                  pl.BlockSpec((9 * M, M), lambda i: (0, 0)),
                  pl.BlockSpec((1, M), lambda i: (0, 0))],
        out_specs=pl.BlockSpec((bt, P, M), lambda i: (i, 0, 0)),
        compiler_params=pltpu.CompilerParams(dimension_semantics=("parallel",)),
    )(x, wcat, b.reshape(1, M))


# ----------------------------------- forward (glue) -----------------------------------

def conv_recursive_net_forward(x_nchw, params, L):
    B, C_in, H, W = x_nchw.shape
    assert C_in == 3 and H == 32 and W == 32, "Linear(8*8*M,10) implies 32x32 RGB input"
    M = params["w_v"].shape[0]

    x = jnp.transpose(x_nchw, (0, 2, 3, 1))                         # NCHW -> NHWC

    # --- V: Conv2d(3, M, 8, stride=1, pad=3) + ReLU ---
    # im2col in bf16 with channels padded 3 -> 4 so K = 8*8*4 = 256 (lane/MXU aligned).
    # TODO(synk): fuse the patch extraction into the conv kernel to avoid this im2col HBM slab.
    x4 = jnp.pad(x, ((0, 0), (0, 0), (0, 0), (0, 1)))               # channels 3 -> 4
    xp = jnp.pad(x4, ((0, 0), (3, 3), (3, 3), (0, 0))).astype(jnp.bfloat16)   # (B,38,38,4)
    Ho = H + 2 * 3 - 8 + 1                                          # 31
    patches = jnp.stack([xp[:, i:i + Ho, j:j + Ho, :]
                         for i in range(8) for j in range(8)], axis=3)        # (B,31,31,64,4)
    patches = patches.reshape(B * Ho * Ho, 8 * 8 * 4)
    wv = jnp.transpose(params["w_v"], (2, 3, 1, 0))                 # (8,8,3,M)
    wv = jnp.pad(wv, ((0, 0), (0, 0), (0, 1), (0, 0))).reshape(8 * 8 * 4, M).astype(jnp.bfloat16)
    v = matmul_bias_act(patches, wv, params["b_v"], relu=True, tm=512)        # (B*961, M) f32
    v = v.reshape(B, Ho, Ho, M)

    # --- P: MaxPool2d(4, stride=4, pad=2) ---
    # Post-ReLU activations are >= 0 and every window has at least one valid tap, so 0-padding
    # is equivalent to PyTorch's -inf padding.  15 elementwise maxima, no window-gather tensor.
    vp = jnp.pad(v, ((0, 0), (2, 2), (2, 2), (0, 0)))               # (B,35,35,M)
    pooled = None
    for i in range(4):
        for j in range(4):
            tap = vp[:, i:i + 29:4, j:j + 29:4, :]                  # (B,8,8,M)
            pooled = tap if pooled is None else jnp.maximum(pooled, tap)
    pooled = pooled.reshape(B, 64, M)

    # --- W: L x ReLU(Conv2d(M, M, 3, pad=1)), all inside one Pallas kernel ---
    wcat = jnp.transpose(params["w_w"], (2, 3, 1, 0)).reshape(9 * M, M).astype(jnp.bfloat16)
    r = recursive_conv(pooled, wcat, params["b_w"], L=L, bt=8)      # (B, 64, M)

    # --- C: Linear(8*8*M, 10), flatten in PyTorch NCHW order (c, h, w) ---
    feat = jnp.transpose(r, (0, 2, 1)).reshape(B, 8 * 8 * M).astype(jnp.bfloat16)
    pad_n = 128 - 10                                                # lane-dense output stores
    wc = jnp.pad(params["w_c"].T, ((0, 0), (0, pad_n))).astype(jnp.bfloat16)  # (8*8*M, 128)
    bc = jnp.pad(params["b_c"], ((0, pad_n),))
    out = matmul_bias_act(feat, wc, bc, relu=False, tm=512)         # (B, 128)
    return out[:, :10]


def init_params(key, M=32):
    k1, k2, k3 = jax.random.split(key, 3)
    return {
        # Conv2d init: N(0, sqrt(2/(kh*kw*out_ch))), bias = 0.01
        "w_v": jax.random.normal(k1, (M, 3, 8, 8), jnp.float32) * np.sqrt(2.0 / (8 * 8 * M)),
        "b_v": jnp.full((M,), 0.01, jnp.float32),
        "w_w": jax.random.normal(k2, (M, M, 3, 3), jnp.float32) * np.sqrt(2.0 / (3 * 3 * M)),
        "b_w": jnp.full((M,), 0.01, jnp.float32),
        # Linear init: N(0, 0.01), bias = 0
        "w_c": jax.random.normal(k3, (10, 8 * 8 * M), jnp.float32) * 0.01,
        "b_c": jnp.zeros((10,), jnp.float32),
    }


if __name__ == "__main__":
    key = jax.random.PRNGKey(0)
    kp, kx = jax.random.split(key)
    M = 32
    L = 3
    params = init_params(kp, M=M)
    x = jax.random.normal(kx, (2, 3, 32, 32), jnp.float32)          # NCHW, like PyTorch

    out = conv_recursive_net_forward(x, params, L)
    out = jax.block_until_ready(out)
    assert out.shape == (2, 10) and out.dtype == jnp.float32
    print("KERNEL_OK")
</pallas_src>

<mosaic_0001>
module attributes {stable_mosaic.version = 11 : i64} {
  func.func @_mm_bias_act_kernel(%arg0: i32, %arg1: memref<512x256xbf16, #tpu.memory_space<vmem>>, %arg2: memref<256x32xbf16, #tpu.memory_space<vmem>>, %arg3: memref<1x32xf32, #tpu.memory_space<vmem>>, %arg4: memref<512x32xf32, #tpu.memory_space<vmem>>) attributes {dimension_semantics = [#tpu.dimension_semantics<parallel>], iteration_bounds = array<i64: 4>, scalar_prefetch = 0 : i64, scratch_operands = 0 : i64, tpu.core_type = #tpu.core_type<tc>, window_params = [{transform_indices = @transform_0, window_bounds = array<i64: 512, 256>}, {pipeline_mode = #tpu.pipeline_mode<synchronous>, transform_indices = @transform_1, window_bounds = array<i64: 256, 32>}, {pipeline_mode = #tpu.pipeline_mode<synchronous>, transform_indices = @transform_2, window_bounds = array<i64: 1, 32>}, {transform_indices = @transform_3, window_bounds = array<i64: 512, 32>}]} {
    %c0 = arith.constant 0 : index
    %c0_0 = arith.constant 0 : index
    %0 = vector.load %arg1[%c0, %c0_0] : memref<512x256xbf16, #tpu.memory_space<vmem>>, vector<512x256xbf16>
    %c0_1 = arith.constant 0 : index
    %c0_2 = arith.constant 0 : index
    %1 = vector.load %arg2[%c0_1, %c0_2] : memref<256x32xbf16, #tpu.memory_space<vmem>>, vector<256x32xbf16>
    %cst = arith.constant dense<0.000000e+00> : vector<512x32xf32>
    %2 = tpu.matmul %0, %1, %cst {dimension_numbers = #tpu.dot_dimension_numbers<[1], [0], [0], [1], [0, 0, 1, 1], [], []>} : vector<512x256xbf16>, vector<256x32xbf16>, vector<512x32xf32> -> vector<512x32xf32>
    %c0_3 = arith.constant 0 : index
    %c0_4 = arith.constant 0 : index
    %3 = vector.load %arg3[%c0_3, %c0_4] : memref<1x32xf32, #tpu.memory_space<vmem>>, vector<1x32xf32>
    %4 = vector.broadcast %3 : vector<1x32xf32> to vector<512x32xf32>
    %5 = arith.addf %2, %4 : vector<512x32xf32>
    %cst_5 = arith.constant 0.000000e+00 : f32
    %6 = vector.broadcast %cst_5 : f32 to vector<512x32xf32>
    %7 = arith.maximumf %5, %6 : vector<512x32xf32>
    %c0_6 = arith.constant 0 : index
    %c0_7 = arith.constant 0 : index
    %8 = vector.load %arg4[%c0_6, %c0_7] : memref<512x32xf32, #tpu.memory_space<vmem>>, vector<512x32xf32>
    tpu.vector_store %arg4[%c0_6, %c0_7], %7 {strides = array<i32>} : memref<512x32xf32, #tpu.memory_space<vmem>>, vector<512x32xf32>,
    return
  }
  func.func @transform_0(%arg0: i32) -> (i32, i32) {
    %c0_i32 = arith.constant 0 : i32
    %c0_i32_0 = arith.constant 0 : i32
    return %arg0, %c0_i32 : i32, i32
  }
  func.func @transform_1(%arg0: i32) -> (i32, i32) {
    %c0_i32 = arith.constant 0 : i32
    %c0_i32_0 = arith.constant 0 : i32
    %c0_i32_1 = arith.constant 0 : i32
    return %c0_i32, %c0_i32_0 : i32, i32
  }
  func.func @transform_2(%arg0: i32) -> (i32, i32) {
    %c0_i32 = arith.constant 0 : i32
    %c0_i32_0 = arith.constant 0 : i32
    %c0_i32_1 = arith.constant 0 : i32
    return %c0_i32, %c0_i32_0 : i32, i32
  }
  func.func @transform_3(%arg0: i32) -> (i32, i32) {
    %c0_i32 = arith.constant 0 : i32
    %c0_i32_0 = arith.constant 0 : i32
    return %arg0, %c0_i32 : i32, i32
  }
}

</mosaic_0001>

<bundles_post_ra>
// kernel: tpu_custom_call.1
= control target key start
LH: loop header
LB: loop body
LE: loop exit
PB: predicated region body
PF: predicated region fallthrough
CT: control target
= control target key end

     0   :  { %8 = vsyncpa [#allocation3], 0  ;;  %s2787_s0 = inlined_call_operand.hbm [shape: bf16[1922,256], index: 0, kind: input, shape index: {}]   ;;  %s2788_s1 = inlined_call_operand.vmem [shape: bf16[256,32], index: 1, kind: input, shape index: {}]   ;;  %s2789_s2 = inlined_call_operand.vmem [shape: f32[1,32], index: 2, kind: input, shape index: {}]   ;;  %s2790_s3 = inlined_call_operand.vmem [shape: f32[1922,32], index: 3, kind: output, shape index: {}]  }
   0x1   :  { %10 = vsyncpa [#allocation3 + $0x1], 0  ;;  %s2135_s12 = smov 0   ;;  %s2137_s13 = smov 0  }
   0x2   :  { %s2139_s14 = smov 0   ;;  %s2141_s15 = smov 0  }
   0x3 LB: > { %s2154_s16 = sadd.s32 4294967295, %s2077_s15   ;;  %s2157_s17 = sadd.s32 1, %s2077_s15   ;;  %s2077_s15 = sphi %s2141_s15, %s2801_s15   ;;  %s2073_s14 = sphi %s2139_s14, %s2800_s14   ;;  %s2069_s13 = sphi %s2137_s13, %s2799_s13   ;;  %s2065_s12 = sphi %s2135_s12, %s2798_s12  }
   0x4   : > { %s20_s18 = ssub.s32 %s2077_s15, %s2157_s17  ;;  %s23_s19 = sadd.s32 1, %s2073_s14 }
   0x5   : > { %p21_p0 = scmp.eq.s32.totalorder %s20_s18, 0  ;;  %p30_p1 = scmp.ne.s32.totalorder %s2073_s14, %s2069_s13 }
   0x6   : > { %p31_p2 = scmp.eq.s32.totalorder %s2077_s15, 0  ;;  %p36_p3 = scmp.ne.s32.totalorder %s2069_s13, %s2065_s12 }
   0x7   : > { %s2167_s20 = scalar_select %p21_p0, %s2073_s14, %s23_s19  }
   0x8   : > { %p32_p4 = por %p31_p2, %p30_p1  ;;  %p37_p5 = scmp.eq.s32.totalorder %s2154_s16, 0 }
   0x9   : > { %p102_p6 = scmp.eq.s32.totalorder %s2154_s16, 3  ;;  %p1622_p9 = scmp.ge.s32.totalorder %s2077_s15, 4 }
   0xa   : > { %p2171_p7 = por %p37_p5, %p36_p3 }
   0xb   : > { %p2175_p8 = por %p102_p6, %p30_p1  ;;  %130 = sbr.rel (%p1622_p9) target bundleno = 53 (0x35), region = 24 }
  0x12   : > { %133 = sbr.rel (!%p32_p4) target bundleno = 53 (0x35), region = 28  ;;  %s134_s23 = sand.u32 (%p32_p4), 1, %s2073_s14  }
  0x13   : > { %s1624_s24 = sshll.u32 (%p32_p4), %s2077_s15, 6  ;;  %s1623_s25 = sshll.u32 (%p32_p4), %s134_s23, 9 }
  0x14   : > { %s140_s26 = ssub.s32 (%p32_p4), 241, %s1624_s24  ;;  %s2185_s29 = scalar_lea.sflag (%p32_p4), [#allocation3], %s134_s23 }
  0x15   : > { %p141_p10 = scmp.lt.s32.totalorder (%p32_p4), %s140_s26, 64  ;;  %s138_s30 = scalar_lea.vmem (%p32_p4), [#allocation2], %s1623_s25 }
  0x19   : > { %s2803_s26 = smov (!%p141_p10, %s140_s26), 64 }
  0x1a   : > { %s2182_s27 = sshll.u32 %s2803_s26, 7 }
  0x1b   : > { %s146_s28 = ssub.s32 8192, %s2182_s27 }
  0x1c   : > { %147 = vsyncadd %s2185_s29, %s146_s28  ;;  %p1627_p11 = scmp.ne.s32.totalorder %s2182_s27, 0  ;;  %s1735_s4 = sshll.u32 %s2077_s15, 13 }
  0x1d   : > { %s2193_s7 = scalar_lea.hbm %s2787_s0, %s1735_s4  ;;  %s153_s8 = sshll.u32 %s138_s30, 4  ;;  %s2195_s8 = int_to_ptr.vmem [resolvable:$true] %s153_s8 }
  0x1e   : > { %s1983_s9 = scalar_lea.hbm %s2193_s7, %s2182_s27  ;;  %s1987_s12 = scalar_lea.hbm %s2787_s0, 30848 }
  0x1f   : > { %p1984_p12 = scmp.ne.s32.totalorder %s2193_s7, %s1983_s9  ;;  %p1988_p1 = scmp.lt.u32.totalorder %s2193_s7, %s2787_s0 }
  0x20   : > { %p1989_p2 = scmp.lt.u32.totalorder %s1987_s12, %s1983_s9  ;;  %p1991_p4 = scmp.lt.u32.totalorder %s1983_s9, %s2193_s7 }
  0x21   : > { %p1985_p13 = pnand %p1984_p12, %p1627_p11 }
  0x22   : > { %p1990_p3 = por %p1989_p2, %p1988_p1 }
  0x23   : > { %p1986_p0 = pneg %p1985_p13 }
  0x24   : > { %p1992_p5 = por %p1991_p4, %p1990_p3 }
  0x26   : > { %p1993_p6 = pnand %p1992_p5, %p1986_p0 }
  0x28   : > { %1996 = shalt.err (!%p1993_p6)
}
  0x29   : > { %s1997_s23 = scalar_lea.vmem %s2195_s8, %s2182_s27  ;;  %s2111_s24 = smov [#allocation2]  }
  0x2a   : > { %p1998_p9 = scmp.ne.s32.totalorder %s2195_s8, %s1997_s23  ;;  %s2001_s25 = sshll.u32 %s2111_s24, 4  ;;  %s2002_s25 = int_to_ptr.vmem [resolvable:$false] %s2001_s25 }
  0x2b   : > { %s2003_s26 = scalar_lea.vmem %s2002_s25, 16384  ;;  %p2004_p13 = scmp.lt.s32.totalorder %s2195_s8, %s2002_s25 }
  0x2c   : > { %p1999_p10 = pnand %p1998_p9, %p1627_p11  ;;  %p2005_p1 = scmp.lt.s32.totalorder %s2003_s26, %s1997_s23 }
  0x2e   : > { %p2000_p12 = pneg %p1999_p10  ;;  %p2006_p2 = por %p2005_p1, %p2004_p13 }
  0x30   : > { %p2007_p3 = pnand %p2006_p2, %p2000_p12 }
  0x32   : > { %2010 = shalt.err (!%p2007_p3)
}
  0x33   : > { %s2112_s28 = smov 128   ;;  %s2113_s30 = smov 8  }
  0x34   : > { %159 = dma.hbm_to_vmem [thread:$0]  (%p1627_p11), %s2193_s7, %s2182_s27, %s2195_s8, %s2185_s29, %s2112_s28, %s2112_s28, %s2113_s30  }
  0x35 PF: > { %p1632_p0 = scmp.ge.s32.totalorder %s2077_s15, 1  ;;  %p161_p4 = scmp.lt.s32.totalorder %s2077_s15, 5 }
  0x37   : > { %p162_p5 = pnand %p1632_p0, %p161_p4 }
  0x38   : > { %s167_s4 = sand.u32 (!%p162_p5), 1, %s2069_s13  }
  0x39   : > { %165 = sbr.rel (%p162_p5) target bundleno = 541 (0x21d), region = 32  ;;  %s2225_s5 = sshll.u32 (!%p162_p5), %s167_s4, 9 }
  0x3a   : > { %s168_s6 = scalar_lea.sflag (!%p162_p5), [#allocation3], %s167_s4  ;;  %s2228_s9 = scalar_lea.vmem (!%p162_p5), [#allocation2], %s2225_s5 }
  0x40   : > { %2060 = dma.done.wait (%p2171_p7), %s168_s6, 8192  }
  0x41   : > { %2062 = vsyncadd (%p2171_p7), %s168_s6, 4294959104  ;;  %v2114_v0 = vmov 0   ;;  %v1871_v1 = vld [vmem:[%s2788_s1] sm:$0xff]   ;;  %v1872_v2 = vld [vmem:[%s2788_s1 + $0x8] sm:$0xff]   ;;  %vm1077_vm0 = vcmask 261120   ;;  %s1736_s28 = sshll.u32 (%p2175_p8), %s2154_s16, 9 }
  0x42   : > { %724 = vmatprep.subr.bf16.mxu0 %v2114_v0  ;;  %1739 = vmatprep.subr.bf16.mxu1 %v2114_v0  ;;  %v1873_v3 = vld [vmem:[%s2788_s1 + $0x10] sm:$0xff]   ;;  %v1874_v4 = vld [vmem:[%s2788_s1 + $0x18] sm:$0xff]   ;;  %v1875_v5 = vld [vmem:[%s2788_s1 + $0x20] sm:$0xff]   ;;  %s2585_s15 = scalar_lea.vmem (%p2175_p8), %s2790_s3, %s1736_s28  }
  0x43   : > { %725 = vmatpush1.bf16.msra.mxu0 %v1871_v1  ;;  %1755 = vmatpush1.bf16.msra.mxu1 %v1871_v1  ;;  %v1889_v6 = vld [vmem:[%s2228_s9 + $0x4] ss:$8 sps:$4 sm:$0xff]   ;;  %v1877_v9 = vld [vmem:[%s2788_s1 + $0x30] sm:$0xff]   ;;  %v1878_v10 = vld [vmem:[%s2788_s1 + $0x38] sm:$0xff]  }
  0x44   : > { %726 = vmatprep.subr.bf16.mxu0 %v2114_v0  ;;  %1740 = vmatprep.subr.bf16.mxu1 %v2114_v0  ;;  %v1876_v7 = vld [vmem:[%s2788_s1 + $0x28] sm:$0xff]   ;;  %v1879_v11 = vld [vmem:[%s2788_s1 + $0x40] sm:$0xff]   ;;  %v1881_v13 = vld [vmem:[%s2788_s1 + $0x50] sm:$0xff]  }
  0x45   : > { %v1892_v8 = vld [vmem:[%s2228_s9 + $0x104] ss:$8 sps:$4 sm:$0xff]   ;;  %756 = vmatprep.mubr.bf16.mxu0 %v1889_v6  ;;  %v1882_v14 = vld [vmem:[%s2788_s1 + $0x58] sm:$0xff]   ;;  %v1885_v17 = vld [vmem:[%s2788_s1 + $0x70] sm:$0xff]  }
  0x46   : > { %884 = vmatprep.mubr.bf16.mxu1 %v1892_v8  ;;  %v1880_v12 = vld [vmem:[%s2788_s1 + $0x48] sm:$0xff]   ;;  %v1883_v15 = vld [vmem:[%s2788_s1 + $0x60] sm:$0xff]   ;;  %v1886_v18 = vld [vmem:[%s2788_s1 + $0x78] sm:$0xff]  }
  0x47   : > { %727 = vmatpush1.bf16.msra.mxu0 %v1872_v2  ;;  %1756 = vmatpush1.bf16.msra.mxu1 %v1872_v2  ;;  %v1884_v16 = vld [vmem:[%s2788_s1 + $0x68] sm:$0xff]   ;;  %v1893_v21 = vld [vmem:[%s2228_s9 + $0x14] ss:$8 sps:$4 sm:$0xff]   ;;  %v1897_v23 = vld [vmem:[%s2228_s9 + $0x10] ss:$8 sps:$4 sm:$0xff]  }
  0x48   : > { %728 = vmatprep.subr.bf16.mxu0 %v2114_v0  ;;  %1741 = vmatprep.subr.bf16.mxu1 %v2114_v0  ;;  %v1887_v19 = vld [vmem:[%s2228_s9] ss:$8 sps:$4 sm:$0xff]   ;;  %v1895_v22 = vld [vmem:[%s2228_s9 + $0x114] ss:$8 sps:$4 sm:$0xff]   ;;  %v1898_v24 = vld [vmem:[%s2228_s9 + $0x110] ss:$8 sps:$4 sm:$0xff]  }
  0x49   : > { %v1890_v20 = vld [vmem:[%s2228_s9 + $0x100] ss:$8 sps:$4 sm:$0xff]   ;;  %v1899_v25 = vld [vmem:[%s2228_s9 + $0x24] ss:$8 sps:$4 sm:$0xff]   ;;  %v1905_v29 = vld [vmem:[%s2228_s9 + $0x34] ss:$8 sps:$4 sm:$0xff]  }
  0x4a   : > { %v1901_v26 = vld [vmem:[%s2228_s9 + $0x124] ss:$8 sps:$4 sm:$0xff]   ;;  %v1903_v27 = vld [vmem:[%s2228_s9 + $0x20] ss:$8 sps:$4 sm:$0xff]   ;;  %v1907_v30 = vld [vmem:[%s2228_s9 + $0x134] ss:$8 sps:$4 sm:$0xff]  }
  0x4b   : > { %729 = vmatpush1.bf16.msra.mxu0 %v1873_v3  ;;  %1757 = vmatpush1.bf16.msra.mxu1 %v1873_v3  ;;  %v1904_v28 = vld [vmem:[%s2228_s9 + $0x120] ss:$8 sps:$4 sm:$0xff]   ;;  %v1909_v31 = vld [vmem:[%s2228_s9 + $0x30] ss:$8 sps:$4 sm:$0xff]   ;;  %v1911_v33 = vld [vmem:[%s2228_s9 + $0x44] ss:$8 sps:$4 sm:$0xff]  }
  0x4c   : > { %730 = vmatprep.subr.bf16.mxu0 %v2114_v0  ;;  %1742 = vmatprep.subr.bf16.mxu1 %v2114_v0  ;;  %v1910_v32 = vld [vmem:[%s2228_s9 + $0x130] ss:$8 sps:$4 sm:$0xff]   ;;  %v1913_v34 = vld [vmem:[%s2228_s9 + $0x144] ss:$8 sps:$4 sm:$0xff]   ;;  %v1915_v35 = vld [vmem:[%s2228_s9 + $0x40] ss:$8 sps:$4 sm:$0xff]  }
  0x4d   : > { %v1916_v36 = vld [vmem:[%s2228_s9 + $0x140] ss:$8 sps:$4 sm:$0xff]   ;;  %v1917_v37 = vld [vmem:[%s2228_s9 + $0x54] ss:$8 sps:$4 sm:$0xff]   ;;  %v1921_v39 = vld [vmem:[%s2228_s9 + $0x50] ss:$8 sps:$4 sm:$0xff]  }
  0x4e   : > { %v1919_v38 = vld [vmem:[%s2228_s9 + $0x154] ss:$8 sps:$4 sm:$0xff]   ;;  %v1922_v40 = vld [vmem:[%s2228_s9 + $0x150] ss:$8 sps:$4 sm:$0xff]   ;;  %v1923_v41 = vld [vmem:[%s2228_s9 + $0x64] ss:$8 sps:$4 sm:$0xff]  }
  0x4f   : > { %731 = vmatpush1.bf16.msra.mxu0 %v1874_v4  ;;  %1758 = vmatpush1.bf16.msra.mxu1 %v1874_v4  ;;  %v1925_v42 = vld [vmem:[%s2228_s9 + $0x164] ss:$8 sps:$4 sm:$0xff]   ;;  %v1927_v43 = vld [vmem:[%s2228_s9 + $0x60] ss:$8 sps:$4 sm:$0xff]   ;;  %v1929_v45 = vld [vmem:[%s2228_s9 + $0x74] ss:$8 sps:$4 sm:$0xff]  }
  0x50   : > { %732 = vmatprep.subr.bf16.mxu0 %v2114_v0  ;;  %1743 = vmatprep.subr.bf16.mxu1 %v2114_v0  ;;  %v1928_v44 = vld [vmem:[%s2228_s9 + $0x160] ss:$8 sps:$4 sm:$0xff]   ;;  %v1931_v46 = vld [vmem:[%s2228_s9 + $0x174] ss:$8 sps:$4 sm:$0xff]   ;;  %v1933_v47 = vld [vmem:[%s2228_s9 + $0x70] ss:$8 sps:$4 sm:$0xff]  }
  0x51   : > { %v1934_v48 = vld [vmem:[%s2228_s9 + $0x170] ss:$8 sps:$4 sm:$0xff]   ;;  %v1935_v49 = vld [vmem:[%s2228_s9 + $0x84] ss:$8 sps:$4 sm:$0xff]   ;;  %v1939_v51 = vld [vmem:[%s2228_s9 + $0x80] ss:$8 sps:$4 sm:$0xff]  }
  0x52   : > { %v1937_v50 = vld [vmem:[%s2228_s9 + $0x184] ss:$8 sps:$4 sm:$0xff]   ;;  %v1940_v52 = vld [vmem:[%s2228_s9 + $0x180] ss:$8 sps:$4 sm:$0xff]   ;;  %v1941_v53 = vld [vmem:[%s2228_s9 + $0x94] ss:$8 sps:$4 sm:$0xff]  }
  0x53   : > { %733 = vmatpush1.bf16.msra.mxu0 %v1875_v5  ;;  %1759 = vmatpush1.bf16.msra.mxu1 %v1875_v5  ;;  %v1943_v54 = vld [vmem:[%s2228_s9 + $0x194] ss:$8 sps:$4 sm:$0xff]   ;;  %v1945_v55 = vld [vmem:[%s2228_s9 + $0x90] ss:$8 sps:$4 sm:$0xff]   ;;  %v1947_v57 = vld [vmem:[%s2228_s9 + $0xa4] ss:$8 sps:$4 sm:$0xff]  }
  0x54   : > { %734 = vmatprep.subr.bf16.mxu0 %v2114_v0  ;;  %1744 = vmatprep.subr.bf16.mxu1 %v2114_v0  ;;  %v1946_v56 = vld [vmem:[%s2228_s9 + $0x190] ss:$8 sps:$4 sm:$0xff]   ;;  %v1949_v58 = vld [vmem:[%s2228_s9 + $0x1a4] ss:$8 sps:$4 sm:$0xff]   ;;  %v1951_v59 = vld [vmem:[%s2228_s9 + $0xa0] ss:$8 sps:$4 sm:$0xff]  }
  0x55   : > { %v1952_v60 = vld [vmem:[%s2228_s9 + $0x1a0] ss:$8 sps:$4 sm:$0xff]   ;;  %v1953_v61 = vld [vmem:[%s2228_s9 + $0xb4] ss:$8 sps:$4 sm:$0xff]   ;;  %v1957_v63 = vld [vmem:[%s2228_s9 + $0xb0] ss:$8 sps:$4 sm:$0xff]  }
  0x56   : > { %v1955_v62 = vld [vmem:[%s2228_s9 + $0x1b4] ss:$8 sps:$4 sm:$0xff]   ;;  %v1959_v1 = vld [vmem:[%s2228_s9 + $0xc4] ss:$8 sps:$4 sm:$0xff]   ;;  %v1963_v3 = vld [vmem:[%s2228_s9 + $0xc0] ss:$8 sps:$4 sm:$0xff]  }
  0x57   : > { %735 = vmatpush1.bf16.msra.mxu0 %v1876_v7  ;;  %1760 = vmatpush1.bf16.msra.mxu1 %v1876_v7  ;;  %v1961_v2 = vld [vmem:[%s2228_s9 + $0x1c4] ss:$8 sps:$4 sm:$0xff]   ;;  %v1964_v4 = vld [vmem:[%s2228_s9 + $0x1c0] ss:$8 sps:$4 sm:$0xff]   ;;  %v1965_v5 = vld [vmem:[%s2228_s9 + $0xd4] ss:$8 sps:$4 sm:$0xff]  }
  0x58   : > { %736 = vmatprep.subr.bf16.mxu0 %v2114_v0  ;;  %1745 = vmatprep.subr.bf16.mxu1 %v2114_v0  ;;  %v1967_v6 = vld [vmem:[%s2228_s9 + $0x1d4] ss:$8 sps:$4 sm:$0xff]   ;;  %v1969_v7 = vld [vmem:[%s2228_s9 + $0xd0] ss:$8 sps:$4 sm:$0xff]  }
  0x59   : > { %v1970_v8 = vld [vmem:[%s2228_s9 + $0x1d0] ss:$8 sps:$4 sm:$0xff]  }
  0x5b   : > { %737 = vmatpush1.bf16.msra.mxu0 %v1877_v9  ;;  %1761 = vmatpush1.bf16.msra.mxu1 %v1877_v9  ;;  %v1971_v9 = vld [vmem:[%s2228_s9 + $0xe4] ss:$8 sps:$4 sm:$0xff]  }
  0x5c   : > { %738 = vmatprep.subr.bf16.mxu0 %v2114_v0  ;;  %1746 = vmatprep.subr.bf16.mxu1 %v2114_v0 }
  0x5f   : > { %739 = vmatpush1.bf16.msra.mxu0 %v1878_v10  ;;  %1762 = vmatpush1.bf16.msra.mxu1 %v1878_v10  ;;  %v1973_v10 = vld [vmem:[%s2228_s9 + $0x1e4] ss:$8 sps:$4 sm:$0xff]  }
  0x60   : > { %740 = vmatprep.subr.bf16.mxu0 %v2114_v0  ;;  %1747 = vmatprep.subr.bf16.mxu1 %v2114_v0 }
  0x63   : > { %741 = vmatpush1.bf16.msra.mxu0 %v1879_v11  ;;  %1763 = vmatpush1.bf16.msra.mxu1 %v1879_v11  ;;  %v1975_v11 = vld [vmem:[%s2228_s9 + $0xe0] ss:$8 sps:$4 sm:$0xff]  }
  0x64   : > { %742 = vmatprep.subr.bf16.mxu0 %v2114_v0  ;;  %1748 = vmatprep.subr.bf16.mxu1 %v2114_v0 }
  0x67   : > { %743 = vmatpush1.bf16.msra.mxu0 %v1880_v12  ;;  %1764 = vmatpush1.bf16.msra.mxu1 %v1880_v12  ;;  %v1976_v12 = vld [vmem:[%s2228_s9 + $0x1e0] ss:$8 sps:$4 sm:$0xff]  }
  0x68   : > { %744 = vmatprep.subr.bf16.mxu0 %v2114_v0  ;;  %1749 = vmatprep.subr.bf16.mxu1 %v2114_v0 }
  0x6b   : > { %745 = vmatpush1.bf16.msra.mxu0 %v1881_v13  ;;  %1765 = vmatpush1.bf16.msra.mxu1 %v1881_v13  ;;  %v1977_v13 = vld [vmem:[%s2228_s9 + $0xf4] ss:$8 sps:$4 sm:$0xff]  }
  0x6c   : > { %746 = vmatprep.subr.bf16.mxu0 %v2114_v0  ;;  %1750 = vmatprep.subr.bf16.mxu1 %v2114_v0 }
  0x6f   : > { %747 = vmatpush1.bf16.msra.mxu0 %v1882_v14  ;;  %1766 = vmatpush1.bf16.msra.mxu1 %v1882_v14  ;;  %v1979_v14 = vld [vmem:[%s2228_s9 + $0x1f4] ss:$8 sps:$4 sm:$0xff]  }
  0x70   : > { %748 = vmatprep.subr.bf16.mxu0 %v2114_v0  ;;  %1751 = vmatprep.subr.bf16.mxu1 %v2114_v0 }
  0x73   : > { %749 = vmatpush1.bf16.msra.mxu0 %v1883_v15  ;;  %1767 = vmatpush1.bf16.msra.mxu1 %v1883_v15  ;;  %v1981_v15 = vld [vmem:[%s2228_s9 + $0xf0] ss:$8 sps:$4 sm:$0xff]  }
  0x74   : > { %750 = vmatprep.subr.bf16.mxu0 %v2114_v0  ;;  %1752 = vmatprep.subr.bf16.mxu1 %v2114_v0 }
  0x77   : > { %751 = vmatpush1.bf16.msra.mxu0 %v1884_v16  ;;  %1768 = vmatpush1.bf16.msra.mxu1 %v1884_v16  ;;  %v1982_v16 = vld [vmem:[%s2228_s9 + $0x1f0] ss:$8 sps:$4 sm:$0xff]  }
  0x78   : > { %752 = vmatprep.subr.bf16.mxu0 %v2114_v0  ;;  %1753 = vmatprep.subr.bf16.mxu1 %v2114_v0 }
  0x7b   : > { %753 = vmatpush1.bf16.msra.mxu0 %v1885_v17  ;;  %1769 = vmatpush1.bf16.msra.mxu1 %v1885_v17  ;;  %v2381_v17 = vld [vmem:[%s2789_s2] ss:$0 sm:$0xff] }
  0x7c   : > { %754 = vmatprep.subr.bf16.mxu0 %v2114_v0  ;;  %1754 = vmatprep.subr.bf16.mxu1 %v2114_v0  ;;  %v1958_v0 = vld [vmem:[%s2228_s9 + $0x1b0] ss:$8 sps:$4 sm:$0xff]   ;;  %s2388_s9 = scalar_lea.vmem [#allocation4], %s2225_s5   ;;  %s1717_s5 = sshll.u32 (%p2175_p8), %s2154_s16, 6 }
  0x7d   : > { %s1150_s30 = ssub.s32 (%p2175_p8), 241, %s1717_s5 }
  0x7e   : > { %p1151_p7 = scmp.lt.s32.totalorder (%p2175_p8), %s1150_s30, 64 }
  0x7f   : > { %755 = vmatpush1.bf16.msra.mxu0 %v1886_v18  ;;  %1770 = vmatpush1.bf16.msra.mxu1 %v1886_v18 }
  0x82   : > { %757 = vmatmul.mubr.bf16.vlgmr.msra.gmra.mrb[0].mxu0 %v1887_v19  ;;  %885 = vmatmul.mubr.bf16.vlgmr.msra.gmra.mrb[0].mxu1 %v1890_v20 }
  0x83   : > { %764 = vmatprep.mubr.bf16.mxu0 %v1893_v21  ;;  %892 = vmatprep.mubr.bf16.mxu1 %v1895_v22 }
  0x8a   : > { %765 = vmatmul.mubr.bf16.gmra.mrb[4].mxu0 %v1897_v23  ;;  %893 = vmatmul.mubr.bf16.gmra.mrb[4].mxu1 %v1898_v24 }
  0x8b   : > { %772 = vmatprep.mubr.bf16.mxu0 %v1899_v25  ;;  %900 = vmatprep.mubr.bf16.mxu1 %v1901_v26 }
  0x92   : > { %773 = vmatmul.mubr.bf16.gmra.mrb[8].mxu0 %v1903_v27  ;;  %901 = vmatmul.mubr.bf16.gmra.mrb[8].mxu1 %v1904_v28 }
  0x93   : > { %780 = vmatprep.mubr.bf16.mxu0 %v1905_v29  ;;  %908 = vmatprep.mubr.bf16.mxu1 %v1907_v30 }
  0x9a   : > { %781 = vmatmul.mubr.bf16.gmra.mrb[12].mxu0 %v1909_v31  ;;  %909 = vmatmul.mubr.bf16.gmra.mrb[12].mxu1 %v1910_v32 }
  0x9b   : > { %788 = vmatprep.mubr.bf16.mxu0 %v1911_v33  ;;  %916 = vmatprep.mubr.bf16.mxu1 %v1913_v34 }
  0xa2   : > { %789 = vmatmul.mubr.bf16.gmra.mrb[16].mxu0 %v1915_v35  ;;  %917 = vmatmul.mubr.bf16.gmra.mrb[16].mxu1 %v1916_v36 }
  0xa3   : > { %796 = vmatprep.mubr.bf16.mxu0 %v1917_v37  ;;  %924 = vmatprep.mubr.bf16.mxu1 %v1919_v38 }
  0xaa   : > { %797 = vmatmul.mubr.bf16.gmra.mrb[20].mxu0 %v1921_v39  ;;  %925 = vmatmul.mubr.bf16.gmra.mrb[20].mxu1 %v1922_v40 }
  0xab   : > { %804 = vmatprep.mubr.bf16.mxu0 %v1923_v41  ;;  %932 = vmatprep.mubr.bf16.mxu1 %v1925_v42 }
  0xb2   : > { %805 = vmatmul.mubr.bf16.gmra.mrb[24].mxu0 %v1927_v43  ;;  %933 = vmatmul.mubr.bf16.gmra.mrb[24].mxu1 %v1928_v44 }
  0xb3   : > { %812 = vmatprep.mubr.bf16.mxu0 %v1929_v45  ;;  %940 = vmatprep.mubr.bf16.mxu1 %v1931_v46 }
  0xba   : > { %813 = vmatmul.mubr.bf16.gmra.mrb[28].mxu0 %v1933_v47  ;;  %941 = vmatmul.mubr.bf16.gmra.mrb[28].mxu1 %v1934_v48 }
  0xbb   : > { %820 = vmatprep.mubr.bf16.mxu0 %v1935_v49  ;;  %948 = vmatprep.mubr.bf16.mxu1 %v1937_v50 }
  0xc2   : > { %821 = vmatmul.mubr.bf16.gmra.mrb[32].mxu0 %v1939_v51  ;;  %949 = vmatmul.mubr.bf16.gmra.mrb[32].mxu1 %v1940_v52 }
  0xc3   : > { %828 = vmatprep.mubr.bf16.mxu0 %v1941_v53  ;;  %956 = vmatprep.mubr.bf16.mxu1 %v1943_v54 }
  0xca   : > { %829 = vmatmul.mubr.bf16.gmra.mrb[36].mxu0 %v1945_v55  ;;  %957 = vmatmul.mubr.bf16.gmra.mrb[36].mxu1 %v1946_v56 }
  0xcb   : > { %836 = vmatprep.mubr.bf16.mxu0 %v1947_v57  ;;  %964 = vmatprep.mubr.bf16.mxu1 %v1949_v58 }
  0xd2   : > { %837 = vmatmul.mubr.bf16.gmra.mrb[40].mxu0 %v1951_v59  ;;  %965 = vmatmul.mubr.bf16.gmra.mrb[40].mxu1 %v1952_v60 }
  0xd3   : > { %844 = vmatprep.mubr.bf16.mxu0 %v1953_v61  ;;  %972 = vmatprep.mubr.bf16.mxu1 %v1955_v62 }
  0xda   : > { %845 = vmatmul.mubr.bf16.gmra.mrb[44].mxu0 %v1957_v63  ;;  %973 = vmatmul.mubr.bf16.gmra.mrb[44].mxu1 %v1958_v0 }
  0xdb   : > { %852 = vmatprep.mubr.bf16.mxu0 %v1959_v1  ;;  %980 = vmatprep.mubr.bf16.mxu1 %v1961_v2 }
  0xe2   : > { %853 = vmatmul.mubr.bf16.gmra.mrb[48].mxu0 %v1963_v3  ;;  %981 = vmatmul.mubr.bf16.gmra.mrb[48].mxu1 %v1964_v4 }
  0xe3   : > { %860 = vmatprep.mubr.bf16.mxu0 %v1965_v5  ;;  %988 = vmatprep.mubr.bf16.mxu1 %v1967_v6 }
  0xea   : > { %861 = vmatmul.mubr.bf16.gmra.mrb[52].mxu0 %v1969_v7  ;;  %989 = vmatmul.mubr.bf16.gmra.mrb[52].mxu1 %v1970_v8 }
  0xeb   : > { %868 = vmatprep.mubr.bf16.mxu0 %v1971_v9  ;;  %996 = vmatprep.mubr.bf16.mxu1 %v1973_v10 }
  0xf2   : > { %869 = vmatmul.mubr.bf16.gmra.mrb[56].mxu0 %v1975_v11  ;;  %997 = vmatmul.mubr.bf16.gmra.mrb[56].mxu1 %v1976_v12 }
  0xf3   : > { %876 = vmatprep.mubr.bf16.mxu0 %v1977_v13  ;;  %1004 = vmatprep.mubr.bf16.mxu1 %v1979_v14 }
  0xfa   : > { %877 = vmatmul.mubr.bf16.gmra.mrb[60].mxu0 %v1981_v15  ;;  %1005 = vmatmul.mubr.bf16.gmra.mrb[60].mxu1 %v1982_v16 }
 0x155   : > { %v758_v18 = vpop.f32.mrb[0].mxu0  ;;  %v886_v19 = vpop.f32.mrb[0].mxu1 }
 0x156   : > { %v759_v20 = vadd.f32 %v2381_v17, %v758_v18  ;;  %v887_v21 = vadd.f32 %v2381_v17, %v886_v19  ;;  %v760_v22 = vpop.f32.mrb[1].mxu0  ;;  %v888_v23 = vpop.f32.mrb[1].mxu1 }
 0x157   : > { %v761_v24 = vpop.f32.mrb[2].mxu0  ;;  %v889_v25 = vpop.f32.mrb[2].mxu1 }
 0x158   : > { %v1013_v26 = vmax.f32 %v759_v20, 0.0  ;;  %v1045_v27 = vmax.f32 %v887_v21, 0.0  ;;  %v762_v28 = vadd.f32 %v2381_v17, %v761_v24  ;;  %v890_v29 = vadd.f32 %v2381_v17, %v889_v25  ;;  %v763_v30 = vpop.f32.mrb[3].mxu0  ;;  %v891_v31 = vpop.f32.mrb[3].mxu1 }
 0x15a   : > { %1078 = vst.msk [vmem:[%s2388_s9] sm:$0xff] %vm1077_vm0, %v1013_v26  ;;  %1110 = vst.msk [vmem:[%s2388_s9 + $0x100] sm:$0xff] %vm1077_vm0, %v1045_v27  ;;  %v1014_v32 = vmax.f32 %v762_v28, 0.0  ;;  %v1046_v33 = vmax.f32 %v890_v29, 0.0 }
 0x15c   : > { %1079 = vst.msk [vmem:[%s2388_s9 + $0x8] sm:$0xff] %vm1077_vm0, %v1014_v32  ;;  %1111 = vst.msk [vmem:[%s2388_s9 + $0x108] sm:$0xff] %vm1077_vm0, %v1046_v33 }
 0x15d   : > { %v766_v34 = vpop.f32.mrb[4].mxu0  ;;  %v894_v35 = vpop.f32.mrb[4].mxu1 }
 0x15e   : > { %v767_v36 = vadd.f32 %v2381_v17, %v766_v34  ;;  %v895_v37 = vadd.f32 %v2381_v17, %v894_v35  ;;  %v768_v38 = vpop.f32.mrb[5].mxu0  ;;  %v896_v39 = vpop.f32.mrb[5].mxu1 }
 0x15f   : > { %v769_v40 = vpop.f32.mrb[6].mxu0  ;;  %v897_v41 = vpop.f32.mrb[6].mxu1 }
 0x160   : > { %v1015_v42 = vmax.f32 %v767_v36, 0.0  ;;  %v1047_v43 = vmax.f32 %v895_v37, 0.0  ;;  %v770_v44 = vadd.f32 %v2381_v17, %v769_v40  ;;  %v898_v45 = vadd.f32 %v2381_v17, %v897_v41  ;;  %v771_v46 = vpop.f32.mrb[7].mxu0  ;;  %v899_v47 = vpop.f32.mrb[7].mxu1 }
 0x162   : > { %1080 = vst.msk [vmem:[%s2388_s9 + $0x10] sm:$0xff] %vm1077_vm0, %v1015_v42  ;;  %1112 = vst.msk [vmem:[%s2388_s9 + $0x110] sm:$0xff] %vm1077_vm0, %v1047_v43  ;;  %v1016_v48 = vmax.f32 %v770_v44, 0.0  ;;  %v1048_v49 = vmax.f32 %v898_v45, 0.0 }
 0x164   : > { %1081 = vst.msk [vmem:[%s2388_s9 + $0x18] sm:$0xff] %vm1077_vm0, %v1016_v48  ;;  %1113 = vst.msk [vmem:[%s2388_s9 + $0x118] sm:$0xff] %vm1077_vm0, %v1048_v49 }
 0x165   : > { %v774_v50 = vpop.f32.mrb[8].mxu0  ;;  %v902_v51 = vpop.f32.mrb[8].mxu1 }
 0x166   : > { %v775_v52 = vadd.f32 %v2381_v17, %v774_v50  ;;  %v903_v53 = vadd.f32 %v2381_v17, %v902_v51  ;;  %v776_v54 = vpop.f32.mrb[9].mxu0  ;;  %v904_v55 = vpop.f32.mrb[9].mxu1 }
 0x167   : > { %v777_v56 = vpop.f32.mrb[10].mxu0  ;;  %v905_v57 = vpop.f32.mrb[10].mxu1 }
 0x168   : > { %v1017_v58 = vmax.f32 %v775_v52, 0.0  ;;  %v1049_v59 = vmax.f32 %v903_v53, 0.0  ;;  %v778_v60 = vadd.f32 %v2381_v17, %v777_v56  ;;  %v906_v61 = vadd.f32 %v2381_v17, %v905_v57  ;;  %v779_v62 = vpop.f32.mrb[11].mxu0  ;;  %v907_v63 = vpop.f32.mrb[11].mxu1 }
 0x16a   : > { %1082 = vst.msk [vmem:[%s2388_s9 + $0x20] sm:$0xff] %vm1077_vm0, %v1017_v58  ;;  %1114 = vst.msk [vmem:[%s2388_s9 + $0x120] sm:$0xff] %vm1077_vm0, %v1049_v59  ;;  %v1018_v0 = vmax.f32 %v778_v60, 0.0  ;;  %v1050_v1 = vmax.f32 %v906_v61, 0.0 }
 0x16c   : > { %1083 = vst.msk [vmem:[%s2388_s9 + $0x28] sm:$0xff] %vm1077_vm0, %v1018_v0  ;;  %1115 = vst.msk [vmem:[%s2388_s9 + $0x128] sm:$0xff] %vm1077_vm0, %v1050_v1 }
 0x16d   : > { %v782_v2 = vpop.f32.mrb[12].mxu0  ;;  %v910_v3 = vpop.f32.mrb[12].mxu1 }
 0x16e   : > { %v783_v4 = vadd.f32 %v2381_v17, %v782_v2  ;;  %v911_v5 = vadd.f32 %v2381_v17, %v910_v3  ;;  %v784_v6 = vpop.f32.mrb[13].mxu0  ;;  %v912_v7 = vpop.f32.mrb[13].mxu1 }
 0x16f   : > { %v785_v8 = vpop.f32.mrb[14].mxu0  ;;  %v913_v9 = vpop.f32.mrb[14].mxu1 }
 0x170   : > { %v1019_v10 = vmax.f32 %v783_v4, 0.0  ;;  %v1051_v11 = vmax.f32 %v911_v5, 0.0  ;;  %v786_v12 = vadd.f32 %v2381_v17, %v785_v8  ;;  %v914_v13 = vadd.f32 %v2381_v17, %v913_v9  ;;  %v787_v14 = vpop.f32.mrb[15].mxu0  ;;  %v915_v15 = vpop.f32.mrb[15].mxu1 }
 0x172   : > { %1084 = vst.msk [vmem:[%s2388_s9 + $0x30] sm:$0xff] %vm1077_vm0, %v1019_v10  ;;  %1116 = vst.msk [vmem:[%s2388_s9 + $0x130] sm:$0xff] %vm1077_vm0, %v1051_v11  ;;  %v1020_v16 = vmax.f32 %v786_v12, 0.0  ;;  %v1052_v18 = vmax.f32 %v914_v13, 0.0 }
 0x174   : > { %1085 = vst.msk [vmem:[%s2388_s9 + $0x38] sm:$0xff] %vm1077_vm0, %v1020_v16  ;;  %1117 = vst.msk [vmem:[%s2388_s9 + $0x138] sm:$0xff] %vm1077_vm0, %v1052_v18 }
 0x175   : > { %v790_v19 = vpop.f32.mrb[16].mxu0  ;;  %v918_v20 = vpop.f32.mrb[16].mxu1 }
 0x176   : > { %v791_v21 = vadd.f32 %v2381_v17, %v790_v19  ;;  %v919_v22 = vadd.f32 %v2381_v17, %v918_v20  ;;  %v792_v23 = vpop.f32.mrb[17].mxu0  ;;  %v920_v24 = vpop.f32.mrb[17].mxu1 }
 0x177   : > { %v793_v25 = vpop.f32.mrb[18].mxu0  ;;  %v921_v26 = vpop.f32.mrb[18].mxu1 }
 0x178   : > { %v1021_v27 = vmax.f32 %v791_v21, 0.0  ;;  %v1053_v28 = vmax.f32 %v919_v22, 0.0  ;;  %v794_v29 = vadd.f32 %v2381_v17, %v793_v25  ;;  %v922_v30 = vadd.f32 %v2381_v17, %v921_v26  ;;  %v795_v31 = vpop.f32.mrb[19].mxu0  ;;  %v923_v32 = vpop.f32.mrb[19].mxu1 }
 0x17a   : > { %1086 = vst.msk [vmem:[%s2388_s9 + $0x40] sm:$0xff] %vm1077_vm0, %v1021_v27  ;;  %1118 = vst.msk [vmem:[%s2388_s9 + $0x140] sm:$0xff] %vm1077_vm0, %v1053_v28  ;;  %v1022_v33 = vmax.f32 %v794_v29, 0.0  ;;  %v1054_v34 = vmax.f32 %v922_v30, 0.0 }
 0x17c   : > { %1087 = vst.msk [vmem:[%s2388_s9 + $0x48] sm:$0xff] %vm1077_vm0, %v1022_v33  ;;  %1119 = vst.msk [vmem:[%s2388_s9 + $0x148] sm:$0xff] %vm1077_vm0, %v1054_v34 }
 0x17d   : > { %v798_v35 = vpop.f32.mrb[20].mxu0  ;;  %v926_v36 = vpop.f32.mrb[20].mxu1 }
 0x17e   : > { %v799_v37 = vadd.f32 %v2381_v17, %v798_v35  ;;  %v927_v38 = vadd.f32 %v2381_v17, %v926_v36  ;;  %v800_v39 = vpop.f32.mrb[21].mxu0  ;;  %v928_v40 = vpop.f32.mrb[21].mxu1 }
 0x17f   : > { %v801_v41 = vpop.f32.mrb[22].mxu0  ;;  %v929_v42 = vpop.f32.mrb[22].mxu1 }
 0x180   : > { %v1023_v43 = vmax.f32 %v799_v37, 0.0  ;;  %v1055_v44 = vmax.f32 %v927_v38, 0.0  ;;  %v802_v45 = vadd.f32 %v2381_v17, %v801_v41  ;;  %v930_v46 = vadd.f32 %v2381_v17, %v929_v42  ;;  %v803_v47 = vpop.f32.mrb[23].mxu0  ;;  %v931_v48 = vpop.f32.mrb[23].mxu1 }
 0x182   : > { %1088 = vst.msk [vmem:[%s2388_s9 + $0x50] sm:$0xff] %vm1077_vm0, %v1023_v43  ;;  %1120 = vst.msk [vmem:[%s2388_s9 + $0x150] sm:$0xff] %vm1077_vm0, %v1055_v44  ;;  %v1024_v49 = vmax.f32 %v802_v45, 0.0  ;;  %v1056_v50 = vmax.f32 %v930_v46, 0.0 }
 0x184   : > { %1089 = vst.msk [vmem:[%s2388_s9 + $0x58] sm:$0xff] %vm1077_vm0, %v1024_v49  ;;  %1121 = vst.msk [vmem:[%s2388_s9 + $0x158] sm:$0xff] %vm1077_vm0, %v1056_v50 }
 0x185   : > { %v806_v51 = vpop.f32.mrb[24].mxu0  ;;  %v934_v52 = vpop.f32.mrb[24].mxu1 }
 0x186   : > { %v807_v53 = vadd.f32 %v2381_v17, %v806_v51  ;;  %v935_v54 = vadd.f32 %v2381_v17, %v934_v52  ;;  %v808_v55 = vpop.f32.mrb[25].mxu0  ;;  %v936_v56 = vpop.f32.mrb[25].mxu1 }
 0x187   : > { %v809_v57 = vpop.f32.mrb[26].mxu0  ;;  %v937_v58 = vpop.f32.mrb[26].mxu1 }
 0x188   : > { %v1025_v59 = vmax.f32 %v807_v53, 0.0  ;;  %v1057_v60 = vmax.f32 %v935_v54, 0.0  ;;  %v810_v61 = vadd.f32 %v2381_v17, %v809_v57  ;;  %v938_v62 = vadd.f32 %v2381_v17, %v937_v58  ;;  %v811_v63 = vpop.f32.mrb[27].mxu0  ;;  %v939_v0 = vpop.f32.mrb[27].mxu1 }
 0x18a   : > { %1090 = vst.msk [vmem:[%s2388_s9 + $0x60] sm:$0xff] %vm1077_vm0, %v1025_v59  ;;  %1122 = vst.msk [vmem:[%s2388_s9 + $0x160] sm:$0xff] %vm1077_vm0, %v1057_v60  ;;  %v1026_v1 = vmax.f32 %v810_v61, 0.0  ;;  %v1058_v2 = vmax.f32 %v938_v62, 0.0 }
 0x18c   : > { %1091 = vst.msk [vmem:[%s2388_s9 + $0x68] sm:$0xff] %vm1077_vm0, %v1026_v1  ;;  %1123 = vst.msk [vmem:[%s2388_s9 + $0x168] sm:$0xff] %vm1077_vm0, %v1058_v2 }
 0x18d   : > { %v814_v3 = vpop.f32.mrb[28].mxu0  ;;  %v942_v4 = vpop.f32.mrb[28].mxu1 }
 0x18e   : > { %v815_v5 = vadd.f32 %v2381_v17, %v814_v3  ;;  %v943_v6 = vadd.f32 %v2381_v17, %v942_v4  ;;  %v816_v7 = vpop.f32.mrb[29].mxu0  ;;  %v944_v8 = vpop.f32.mrb[29].mxu1 }
 0x18f   : > { %v817_v9 = vpop.f32.mrb[30].mxu0  ;;  %v945_v10 = vpop.f32.mrb[30].mxu1 }
 0x190   : > { %v1027_v11 = vmax.f32 %v815_v5, 0.0  ;;  %v1059_v12 = vmax.f32 %v943_v6, 0.0  ;;  %v818_v13 = vadd.f32 %v2381_v17, %v817_v9  ;;  %v946_v14 = vadd.f32 %v2381_v17, %v945_v10  ;;  %v819_v15 = vpop.f32.mrb[31].mxu0  ;;  %v947_v16 = vpop.f32.mrb[31].mxu1 }
 0x192   : > { %1092 = vst.msk [vmem:[%s2388_s9 + $0x70] sm:$0xff] %vm1077_vm0, %v1027_v11  ;;  %1124 = vst.msk [vmem:[%s2388_s9 + $0x170] sm:$0xff] %vm1077_vm0, %v1059_v12  ;;  %v1028_v18 = vmax.f32 %v818_v13, 0.0  ;;  %v1060_v19 = vmax.f32 %v946_v14, 0.0 }
 0x194   : > { %1093 = vst.msk [vmem:[%s2388_s9 + $0x78] sm:$0xff] %vm1077_vm0, %v1028_v18  ;;  %1125 = vst.msk [vmem:[%s2388_s9 + $0x178] sm:$0xff] %vm1077_vm0, %v1060_v19 }
 0x195   : > { %v822_v20 = vpop.f32.mrb[32].mxu0  ;;  %v950_v21 = vpop.f32.mrb[32].mxu1 }
 0x196   : > { %v823_v22 = vadd.f32 %v2381_v17, %v822_v20  ;;  %v951_v23 = vadd.f32 %v2381_v17, %v950_v21  ;;  %v824_v24 = vpop.f32.mrb[33].mxu0  ;;  %v952_v25 = vpop.f32.mrb[33].mxu1 }
 0x197   : > { %v825_v26 = vpop.f32.mrb[34].mxu0  ;;  %v953_v27 = vpop.f32.mrb[34].mxu1 }
 0x198   : > { %v1029_v28 = vmax.f32 %v823_v22, 0.0  ;;  %v1061_v29 = vmax.f32 %v951_v23, 0.0  ;;  %v826_v30 = vadd.f32 %v2381_v17, %v825_v26  ;;  %v954_v31 = vadd.f32 %v2381_v17, %v953_v27  ;;  %v827_v32 = vpop.f32.mrb[35].mxu0  ;;  %v955_v33 = vpop.f32.mrb[35].mxu1 }
 0x19a   : > { %1094 = vst.msk [vmem:[%s2388_s9 + $0x80] sm:$0xff] %vm1077_vm0, %v1029_v28  ;;  %1126 = vst.msk [vmem:[%s2388_s9 + $0x180] sm:$0xff] %vm1077_vm0, %v1061_v29  ;;  %v1030_v34 = vmax.f32 %v826_v30, 0.0  ;;  %v1062_v35 = vmax.f32 %v954_v31, 0.0 }
 0x19c   : > { %1095 = vst.msk [vmem:[%s2388_s9 + $0x88] sm:$0xff] %vm1077_vm0, %v1030_v34  ;;  %1127 = vst.msk [vmem:[%s2388_s9 + $0x188] sm:$0xff] %vm1077_vm0, %v1062_v35 }
 0x19d   : > { %v830_v36 = vpop.f32.mrb[36].mxu0  ;;  %v958_v37 = vpop.f32.mrb[36].mxu1 }
 0x19e   : > { %v831_v38 = vadd.f32 %v2381_v17, %v830_v36  ;;  %v959_v39 = vadd.f32 %v2381_v17, %v958_v37  ;;  %v832_v40 = vpop.f32.mrb[37].mxu0  ;;  %v960_v41 = vpop.f32.mrb[37].mxu1 }
 0x19f   : > { %v833_v42 = vpop.f32.mrb[38].mxu0  ;;  %v961_v43 = vpop.f32.mrb[38].mxu1 }
 0x1a0   : > { %v1031_v44 = vmax.f32 %v831_v38, 0.0  ;;  %v1063_v45 = vmax.f32 %v959_v39, 0.0  ;;  %v834_v46 = vadd.f32 %v2381_v17, %v833_v42  ;;  %v962_v47 = vadd.f32 %v2381_v17, %v961_v43  ;;  %v835_v48 = vpop.f32.mrb[39].mxu0  ;;  %v963_v49 = vpop.f32.mrb[39].mxu1 }
 0x1a2   : > { %1096 = vst.msk [vmem:[%s2388_s9 + $0x90] sm:$0xff] %vm1077_vm0, %v1031_v44  ;;  %1128 = vst.msk [vmem:[%s2388_s9 + $0x190] sm:$0xff] %vm1077_vm0, %v1063_v45  ;;  %v1032_v50 = vmax.f32 %v834_v46, 0.0  ;;  %v1064_v51 = vmax.f32 %v962_v47, 0.0 }
 0x1a4   : > { %1097 = vst.msk [vmem:[%s2388_s9 + $0x98] sm:$0xff] %vm1077_vm0, %v1032_v50  ;;  %1129 = vst.msk [vmem:[%s2388_s9 + $0x198] sm:$0xff] %vm1077_vm0, %v1064_v51 }
 0x1a5   : > { %v838_v52 = vpop.f32.mrb[40].mxu0  ;;  %v966_v53 = vpop.f32.mrb[40].mxu1 }
 0x1a6   : > { %v839_v54 = vadd.f32 %v2381_v17, %v838_v52  ;;  %v967_v55 = vadd.f32 %v2381_v17, %v966_v53  ;;  %v840_v56 = vpop.f32.mrb[41].mxu0  ;;  %v968_v57 = vpop.f32.mrb[41].mxu1 }
 0x1a7   : > { %v841_v58 = vpop.f32.mrb[42].mxu0  ;;  %v969_v59 = vpop.f32.mrb[42].mxu1 }
 0x1a8   : > { %v1033_v60 = vmax.f32 %v839_v54, 0.0  ;;  %v1065_v61 = vmax.f32 %v967_v55, 0.0  ;;  %v842_v62 = vadd.f32 %v2381_v17, %v841_v58  ;;  %v970_v63 = vadd.f32 %v2381_v17, %v969_v59  ;;  %v843_v0 = vpop.f32.mrb[43].mxu0  ;;  %v971_v1 = vpop.f32.mrb[43].mxu1 }
 0x1aa   : > { %1098 = vst.msk [vmem:[%s2388_s9 + $0xa0] sm:$0xff] %vm1077_vm0, %v1033_v60  ;;  %1130 = vst.msk [vmem:[%s2388_s9 + $0x1a0] sm:$0xff] %vm1077_vm0, %v1065_v61  ;;  %v1034_v2 = vmax.f32 %v842_v62, 0.0  ;;  %v1066_v3 = vmax.f32 %v970_v63, 0.0 }
 0x1ac   : > { %1099 = vst.msk [vmem:[%s2388_s9 + $0xa8] sm:$0xff] %vm1077_vm0, %v1034_v2  ;;  %1131 = vst.msk [vmem:[%s2388_s9 + $0x1a8] sm:$0xff] %vm1077_vm0, %v1066_v3 }
 0x1ad   : > { %v846_v4 = vpop.f32.mrb[44].mxu0  ;;  %v974_v5 = vpop.f32.mrb[44].mxu1 }
 0x1ae   : > { %v847_v6 = vadd.f32 %v2381_v17, %v846_v4  ;;  %v975_v7 = vadd.f32 %v2381_v17, %v974_v5  ;;  %v848_v8 = vpop.f32.mrb[45].mxu0  ;;  %v976_v9 = vpop.f32.mrb[45].mxu1 }
 0x1af   : > { %v849_v10 = vpop.f32.mrb[46].mxu0  ;;  %v977_v11 = vpop.f32.mrb[46].mxu1 }
 0x1b0   : > { %v1035_v12 = vmax.f32 %v847_v6, 0.0  ;;  %v1067_v13 = vmax.f32 %v975_v7, 0.0  ;;  %v850_v14 = vadd.f32 %v2381_v17, %v849_v10  ;;  %v978_v15 = vadd.f32 %v2381_v17, %v977_v11  ;;  %v851_v16 = vpop.f32.mrb[47].mxu0  ;;  %v979_v18 = vpop.f32.mrb[47].mxu1 }
 0x1b2   : > { %1100 = vst.msk [vmem:[%s2388_s9 + $0xb0] sm:$0xff] %vm1077_vm0, %v1035_v12  ;;  %1132 = vst.msk [vmem:[%s2388_s9 + $0x1b0] sm:$0xff] %vm1077_vm0, %v1067_v13  ;;  %v1036_v19 = vmax.f32 %v850_v14, 0.0  ;;  %v1068_v20 = vmax.f32 %v978_v15, 0.0 }
 0x1b4   : > { %1101 = vst.msk [vmem:[%s2388_s9 + $0xb8] sm:$0xff] %vm1077_vm0, %v1036_v19  ;;  %1133 = vst.msk [vmem:[%s2388_s9 + $0x1b8] sm:$0xff] %vm1077_vm0, %v1068_v20 }
 0x1b5   : > { %v854_v21 = vpop.f32.mrb[48].mxu0  ;;  %v982_v22 = vpop.f32.mrb[48].mxu1 }
 0x1b6   : > { %v855_v23 = vadd.f32 %v2381_v17, %v854_v21  ;;  %v983_v24 = vadd.f32 %v2381_v17, %v982_v22  ;;  %v856_v25 = vpop.f32.mrb[49].mxu0  ;;  %v984_v26 = vpop.f32.mrb[49].mxu1 }
 0x1b7   : > { %v857_v27 = vpop.f32.mrb[50].mxu0  ;;  %v985_v28 = vpop.f32.mrb[50].mxu1 }
 0x1b8   : > { %v1037_v29 = vmax.f32 %v855_v23, 0.0  ;;  %v1069_v30 = vmax.f32 %v983_v24, 0.0  ;;  %v858_v31 = vadd.f32 %v2381_v17, %v857_v27  ;;  %v986_v32 = vadd.f32 %v2381_v17, %v985_v28  ;;  %v859_v33 = vpop.f32.mrb[51].mxu0  ;;  %v987_v34 = vpop.f32.mrb[51].mxu1 }
 0x1ba   : > { %1102 = vst.msk [vmem:[%s2388_s9 + $0xc0] sm:$0xff] %vm1077_vm0, %v1037_v29  ;;  %1134 = vst.msk [vmem:[%s2388_s9 + $0x1c0] sm:$0xff] %vm1077_vm0, %v1069_v30  ;;  %v1038_v35 = vmax.f32 %v858_v31, 0.0  ;;  %v1070_v36 = vmax.f32 %v986_v32, 0.0 }
 0x1bc   : > { %1103 = vst.msk [vmem:[%s2388_s9 + $0xc8] sm:$0xff] %vm1077_vm0, %v1038_v35  ;;  %1135 = vst.msk [vmem:[%s2388_s9 + $0x1c8] sm:$0xff] %vm1077_vm0, %v1070_v36 }
 0x1bd   : > { %v862_v37 = vpop.f32.mrb[52].mxu0  ;;  %v990_v38 = vpop.f32.mrb[52].mxu1 }
 0x1be   : > { %v863_v39 = vadd.f32 %v2381_v17, %v862_v37  ;;  %v991_v40 = vadd.f32 %v2381_v17, %v990_v38  ;;  %v864_v41 = vpop.f32.mrb[53].mxu0  ;;  %v992_v42 = vpop.f32.mrb[53].mxu1 }
 0x1bf   : > { %v865_v43 = vpop.f32.mrb[54].mxu0  ;;  %v993_v44 = vpop.f32.mrb[54].mxu1 }
 0x1c0   : > { %v1039_v45 = vmax.f32 %v863_v39, 0.0  ;;  %v1071_v46 = vmax.f32 %v991_v40, 0.0  ;;  %v866_v47 = vadd.f32 %v2381_v17, %v865_v43  ;;  %v994_v48 = vadd.f32 %v2381_v17, %v993_v44  ;;  %v867_v49 = vpop.f32.mrb[55].mxu0  ;;  %v995_v50 = vpop.f32.mrb[55].mxu1 }
 0x1c2   : > { %1104 = vst.msk [vmem:[%s2388_s9 + $0xd0] sm:$0xff] %vm1077_vm0, %v1039_v45  ;;  %1136 = vst.msk [vmem:[%s2388_s9 + $0x1d0] sm:$0xff] %vm1077_vm0, %v1071_v46  ;;  %v1040_v51 = vmax.f32 %v866_v47, 0.0  ;;  %v1072_v52 = vmax.f32 %v994_v48, 0.0 }
 0x1c4   : > { %1105 = vst.msk [vmem:[%s2388_s9 + $0xd8] sm:$0xff] %vm1077_vm0, %v1040_v51  ;;  %1137 = vst.msk [vmem:[%s2388_s9 + $0x1d8] sm:$0xff] %vm1077_vm0, %v1072_v52 }
 0x1c5   : > { %v870_v53 = vpop.f32.mrb[56].mxu0  ;;  %v998_v54 = vpop.f32.mrb[56].mxu1 }
 0x1c6   : > { %v871_v55 = vadd.f32 %v2381_v17, %v870_v53  ;;  %v999_v56 = vadd.f32 %v2381_v17, %v998_v54  ;;  %v872_v57 = vpop.f32.mrb[57].mxu0  ;;  %v1000_v58 = vpop.f32.mrb[57].mxu1 }
 0x1c7   : > { %v873_v59 = vpop.f32.mrb[58].mxu0  ;;  %v1001_v60 = vpop.f32.mrb[58].mxu1 }
 0x1c8   : > { %v1041_v61 = vmax.f32 %v871_v55, 0.0  ;;  %v1073_v62 = vmax.f32 %v999_v56, 0.0  ;;  %v874_v63 = vadd.f32 %v2381_v17, %v873_v59  ;;  %v1002_v0 = vadd.f32 %v2381_v17, %v1001_v60  ;;  %v875_v1 = vpop.f32.mrb[59].mxu0  ;;  %v1003_v2 = vpop.f32.mrb[59].mxu1 }
 0x1ca   : > { %1106 = vst.msk [vmem:[%s2388_s9 + $0xe0] sm:$0xff] %vm1077_vm0, %v1041_v61  ;;  %1138 = vst.msk [vmem:[%s2388_s9 + $0x1e0] sm:$0xff] %vm1077_vm0, %v1073_v62  ;;  %v1042_v3 = vmax.f32 %v874_v63, 0.0  ;;  %v1074_v4 = vmax.f32 %v1002_v0, 0.0 }
 0x1cc   : > { %1107 = vst.msk [vmem:[%s2388_s9 + $0xe8] sm:$0xff] %vm1077_vm0, %v1042_v3  ;;  %1139 = vst.msk [vmem:[%s2388_s9 + $0x1e8] sm:$0xff] %vm1077_vm0, %v1074_v4 }
 0x1cd   : > { %v878_v5 = vpop.f32.mrb[60].mxu0  ;;  %v1006_v6 = vpop.f32.mrb[60].mxu1 }
 0x1ce   : > { %v879_v7 = vadd.f32 %v2381_v17, %v878_v5  ;;  %v1007_v8 = vadd.f32 %v2381_v17, %v1006_v6  ;;  %v880_v9 = vpop.f32.mrb[61].mxu0  ;;  %v1008_v10 = vpop.f32.mrb[61].mxu1  ;;  %1148 = sbr.rel (!%p2175_p8) target bundleno = 541 (0x21d), region = 40 }
 0x1cf   : > { %v881_v11 = vpop.f32.mrb[62].mxu0  ;;  %v1009_v12 = vpop.f32.mrb[62].mxu1 }
 0x1d0   : > { %v1043_v13 = vmax.f32 %v879_v7, 0.0  ;;  %v1075_v14 = vmax.f32 %v1007_v8, 0.0  ;;  %v882_v15 = vadd.f32 %v2381_v17, %v881_v11  ;;  %v1010_v16 = vadd.f32 %v2381_v17, %v1009_v12  ;;  %v883_v18 = vpop.f32.mrb[63].mxu0  ;;  %v1011_v19 = vpop.f32.mrb[63].mxu1 }
 0x1d2   : > { %1108 = vst.msk [vmem:[%s2388_s9 + $0xf0] sm:$0xff] %vm1077_vm0, %v1043_v13  ;;  %1140 = vst.msk [vmem:[%s2388_s9 + $0x1f0] sm:$0xff] %vm1077_vm0, %v1075_v14  ;;  %v1044_v20 = vmax.f32 %v882_v15, 0.0  ;;  %v1076_v21 = vmax.f32 %v1010_v16, 0.0 }
 0x1d4   : > { %1109 = vst.msk [vmem:[%s2388_s9 + $0xf8] sm:$0xff] %vm1077_vm0, %v1044_v20  ;;  %1141 = vst.msk [vmem:[%s2388_s9 + $0x1f8] sm:$0xff] %vm1077_vm0, %v1076_v21 }
 0x1d5   : > { %s2805_s30 = smov (!%p1151_p7, %s1150_s30), 64 }
 0x1d6   : > { %s1718_s27 = sshll.u32 %s2805_s30, 7 }
 0x1d7   : > { %p1721_p11 = scmp.eq.s32.totalorder %s1718_s27, 0 }
 0x1d8   : > { %s2591_s22 = sshrl.u32 (!%p1721_p11), %s2805_s30, 6 }
 0x1d9   : > { %1159 = sbr.rel (%p1721_p11) target bundleno = 541 (0x21d), region = 44  ;;  %p1722_p8 = scmp.le.s32.totalorder (!%p1721_p11), %s2591_s22, 0 }
 0x1e0   : > { %1573 = sbr.rel (%p1722_p8) target bundleno = 520 (0x208), region = 126  ;;  %s2793_s16 = smov (!%p1722_p8), %s2585_s15 }
 0x1e1   : > { %s2794_s29 = smov (!%p1722_p8), %s2388_s9  ;;  %s2600_s7 = smov (!%p1722_p8), 0  }
 0x1e2   : > { %s2602_s21 = smov (!%p1722_p8), 0  }
 0x1e7 LB: >> { %v1347_v17 = vld [vmem:[%s2085_s29] sm:$0xff]  ;;  %v1349_v22 = vld [vmem:[%s2085_s29 + $0x8] sm:$0xff]  ;;  %v1351_v23 = vld [vmem:[%s2085_s29 + $0x10] sm:$0xff]  ;;  %s1475_s8 = sadd.s32 1, %s2089_s7  ;;  %s1341_s21 = sadd.s32 1, %s2093_s21   ;;  %s2093_s21 = sphi %s2602_s21, %s1341_s21   ;;  %s2089_s7 = sphi %s2600_s7, %s2797_s7   ;;  %s2085_s29 = sphi %s2794_s29, %s2796_s29   ;;  %s2081_s16 = sphi %s2793_s16, %s2795_s16  }
 0x1e8   : >> { %1348 = vst [vmem:[%s2081_s16] sm:$0xff] %v1347_v17  ;;  %1350 = vst [vmem:[%s2081_s16 + $0x8] sm:$0xff] %v1349_v22  ;;  %v1353_v24 = vld [vmem:[%s2085_s29 + $0x18] sm:$0xff]  ;;  %v1355_v25 = vld [vmem:[%s2085_s29 + $0x20] sm:$0xff]  ;;  %p1476_p6 = scmp.ge.s32.totalorder %s1475_s8, %s2591_s22  ;;  %p1340_p9 = scmp.ge.s32.totalorder %s1341_s21, %s2591_s22 }
 0x1e9   : >> { %1352 = vst [vmem:[%s2081_s16 + $0x10] sm:$0xff] %v1351_v23  ;;  %v1357_v26 = vld [vmem:[%s2085_s29 + $0x28] sm:$0xff]  ;;  %1354 = vst [vmem:[%s2081_s16 + $0x18] sm:$0xff] %v1353_v24  ;;  %v1359_v27 = vld [vmem:[%s2085_s29 + $0x30] sm:$0xff] }
 0x1ea   : >> { %1356 = vst [vmem:[%s2081_s16 + $0x20] sm:$0xff] %v1355_v25  ;;  %1358 = vst [vmem:[%s2081_s16 + $0x28] sm:$0xff] %v1357_v26  ;;  %v1361_v28 = vld [vmem:[%s2085_s29 + $0x38] sm:$0xff]  ;;  %v1363_v29 = vld [vmem:[%s2085_s29 + $0x40] sm:$0xff]  ;;  %s2807_s8 = smov (%p1476_p6, %s1475_s8), 0 }
 0x1eb   : >> { %1360 = vst [vmem:[%s2081_s16 + $0x30] sm:$0xff] %v1359_v27  ;;  %1362 = vst [vmem:[%s2081_s16 + $0x38] sm:$0xff] %v1361_v28  ;;  %v1365_v30 = vld [vmem:[%s2085_s29 + $0x48] sm:$0xff]  ;;  %v1367_v31 = vld [vmem:[%s2085_s29 + $0x50] sm:$0xff]  ;;  %s1723_s10 = sshll.u32 %s2807_s8, 9  ;;  %s2797_s7 = smov %s2807_s8 }
 0x1ec   : >> { %1364 = vst [vmem:[%s2081_s16 + $0x40] sm:$0xff] %v1363_v29  ;;  %v1369_v32 = vld [vmem:[%s2085_s29 + $0x58] sm:$0xff]  ;;  %1366 = vst [vmem:[%s2081_s16 + $0x48] sm:$0xff] %v1365_v30  ;;  %v1371_v33 = vld [vmem:[%s2085_s29 + $0x60] sm:$0xff]  ;;  %s2658_s11 = scalar_lea.vmem %s2388_s9, %s1723_s10 [#allocation4]   ;;  %s2661_s12 = scalar_lea.vmem %s2585_s15, %s1723_s10  }
 0x1ed   : >> { %1368 = vst [vmem:[%s2081_s16 + $0x50] sm:$0xff] %v1367_v31  ;;  %1370 = vst [vmem:[%s2081_s16 + $0x58] sm:$0xff] %v1369_v32  ;;  %v1373_v34 = vld [vmem:[%s2085_s29 + $0x68] sm:$0xff]  ;;  %v1375_v35 = vld [vmem:[%s2085_s29 + $0x70] sm:$0xff] }
 0x1ee   : >> { %1372 = vst [vmem:[%s2081_s16 + $0x60] sm:$0xff] %v1371_v33  ;;  %1374 = vst [vmem:[%s2081_s16 + $0x68] sm:$0xff] %v1373_v34  ;;  %v1377_v36 = vld [vmem:[%s2085_s29 + $0x78] sm:$0xff]  ;;  %v1379_v37 = vld [vmem:[%s2085_s29 + $0x80] sm:$0xff] }
 0x1ef   : >> { %1376 = vst [vmem:[%s2081_s16 + $0x70] sm:$0xff] %v1375_v35  ;;  %v1381_v38 = vld [vmem:[%s2085_s29 + $0x88] sm:$0xff]  ;;  %1378 = vst [vmem:[%s2081_s16 + $0x78] sm:$0xff] %v1377_v36  ;;  %v1383_v39 = vld [vmem:[%s2085_s29 + $0x90] sm:$0xff] }
 0x1f0   : >> { %1380 = vst [vmem:[%s2081_s16 + $0x80] sm:$0xff] %v1379_v37  ;;  %1382 = vst [vmem:[%s2081_s16 + $0x88] sm:$0xff] %v1381_v38  ;;  %v1385_v40 = vld [vmem:[%s2085_s29 + $0x98] sm:$0xff]  ;;  %v1387_v41 = vld [vmem:[%s2085_s29 + $0xa0] sm:$0xff] }
 0x1f1   : >> { %1384 = vst [vmem:[%s2081_s16 + $0x90] sm:$0xff] %v1383_v39  ;;  %1386 = vst [vmem:[%s2081_s16 + $0x98] sm:$0xff] %v1385_v40  ;;  %v1389_v42 = vld [vmem:[%s2085_s29 + $0xa8] sm:$0xff]  ;;  %v1391_v43 = vld [vmem:[%s2085_s29 + $0xb0] sm:$0xff] }
 0x1f2   : >> { %1388 = vst [vmem:[%s2081_s16 + $0xa0] sm:$0xff] %v1387_v41  ;;  %v1393_v44 = vld [vmem:[%s2085_s29 + $0xb8] sm:$0xff]  ;;  %1390 = vst [vmem:[%s2081_s16 + $0xa8] sm:$0xff] %v1389_v42  ;;  %v1395_v45 = vld [vmem:[%s2085_s29 + $0xc0] sm:$0xff] }
 0x1f3   : >> { %1392 = vst [vmem:[%s2081_s16 + $0xb0] sm:$0xff] %v1391_v43  ;;  %1394 = vst [vmem:[%s2081_s16 + $0xb8] sm:$0xff] %v1393_v44  ;;  %v1397_v46 = vld [vmem:[%s2085_s29 + $0xc8] sm:$0xff]  ;;  %v1399_v47 = vld [vmem:[%s2085_s29 + $0xd0] sm:$0xff] }
 0x1f4   : >> { %1396 = vst [vmem:[%s2081_s16 + $0xc0] sm:$0xff] %v1395_v45  ;;  %1398 = vst [vmem:[%s2081_s16 + $0xc8] sm:$0xff] %v1397_v46  ;;  %v1401_v48 = vld [vmem:[%s2085_s29 + $0xd8] sm:$0xff]  ;;  %v1403_v49 = vld [vmem:[%s2085_s29 + $0xe0] sm:$0xff] }
 0x1f5   : >> { %1400 = vst [vmem:[%s2081_s16 + $0xd0] sm:$0xff] %v1399_v47  ;;  %v1405_v50 = vld [vmem:[%s2085_s29 + $0xe8] sm:$0xff]  ;;  %1402 = vst [vmem:[%s2081_s16 + $0xd8] sm:$0xff] %v1401_v48  ;;  %v1407_v51 = vld [vmem:[%s2085_s29 + $0xf0] sm:$0xff] }
 0x1f6   : >> { %1404 = vst [vmem:[%s2081_s16 + $0xe0] sm:$0xff] %v1403_v49  ;;  %1406 = vst [vmem:[%s2081_s16 + $0xe8] sm:$0xff] %v1405_v50  ;;  %v1409_v52 = vld [vmem:[%s2085_s29 + $0xf8] sm:$0xff]  ;;  %v1411_v53 = vld [vmem:[%s2085_s29 + $0x100] sm:$0xff] }
 0x1f7   : >> { %1408 = vst [vmem:[%s2081_s16 + $0xf0] sm:$0xff] %v1407_v51  ;;  %1410 = vst [vmem:[%s2081_s16 + $0xf8] sm:$0xff] %v1409_v52  ;;  %v1413_v54 = vld [vmem:[%s2085_s29 + $0x108] sm:$0xff]  ;;  %v1415_v55 = vld [vmem:[%s2085_s29 + $0x110] sm:$0xff] }
 0x1f8   : >> { %1412 = vst [vmem:[%s2081_s16 + $0x100] sm:$0xff] %v1411_v53  ;;  %v1417_v56 = vld [vmem:[%s2085_s29 + $0x118] sm:$0xff]  ;;  %1414 = vst [vmem:[%s2081_s16 + $0x108] sm:$0xff] %v1413_v54  ;;  %v1419_v57 = vld [vmem:[%s2085_s29 + $0x120] sm:$0xff] }
 0x1f9   : >> { %1416 = vst [vmem:[%s2081_s16 + $0x110] sm:$0xff] %v1415_v55  ;;  %1418 = vst [vmem:[%s2081_s16 + $0x118] sm:$0xff] %v1417_v56  ;;  %v1421_v58 = vld [vmem:[%s2085_s29 + $0x128] sm:$0xff]  ;;  %v1423_v59 = vld [vmem:[%s2085_s29 + $0x130] sm:$0xff] }
 0x1fa   : >> { %1420 = vst [vmem:[%s2081_s16 + $0x120] sm:$0xff] %v1419_v57  ;;  %1422 = vst [vmem:[%s2081_s16 + $0x128] sm:$0xff] %v1421_v58  ;;  %v1425_v60 = vld [vmem:[%s2085_s29 + $0x138] sm:$0xff]  ;;  %v1427_v61 = vld [vmem:[%s2085_s29 + $0x140] sm:$0xff] }
 0x1fb   : >> { %1424 = vst [vmem:[%s2081_s16 + $0x130] sm:$0xff] %v1423_v59  ;;  %v1429_v62 = vld [vmem:[%s2085_s29 + $0x148] sm:$0xff]  ;;  %1426 = vst [vmem:[%s2081_s16 + $0x138] sm:$0xff] %v1425_v60  ;;  %v1431_v63 = vld [vmem:[%s2085_s29 + $0x150] sm:$0xff] }
 0x1fc   : >> { %1428 = vst [vmem:[%s2081_s16 + $0x140] sm:$0xff] %v1427_v61  ;;  %1430 = vst [vmem:[%s2081_s16 + $0x148] sm:$0xff] %v1429_v62  ;;  %v1433_v0 = vld [vmem:[%s2085_s29 + $0x158] sm:$0xff]  ;;  %v1435_v1 = vld [vmem:[%s2085_s29 + $0x160] sm:$0xff] }
 0x1fd   : >> { %1432 = vst [vmem:[%s2081_s16 + $0x150] sm:$0xff] %v1431_v63  ;;  %1434 = vst [vmem:[%s2081_s16 + $0x158] sm:$0xff] %v1433_v0  ;;  %v1437_v2 = vld [vmem:[%s2085_s29 + $0x168] sm:$0xff]  ;;  %v1439_v3 = vld [vmem:[%s2085_s29 + $0x170] sm:$0xff] }
 0x1fe   : >> { %1436 = vst [vmem:[%s2081_s16 + $0x160] sm:$0xff] %v1435_v1  ;;  %v1441_v4 = vld [vmem:[%s2085_s29 + $0x178] sm:$0xff]  ;;  %1438 = vst [vmem:[%s2081_s16 + $0x168] sm:$0xff] %v1437_v2  ;;  %v1443_v5 = vld [vmem:[%s2085_s29 + $0x180] sm:$0xff] }
 0x1ff   : >> { %1440 = vst [vmem:[%s2081_s16 + $0x170] sm:$0xff] %v1439_v3  ;;  %1442 = vst [vmem:[%s2081_s16 + $0x178] sm:$0xff] %v1441_v4  ;;  %v1445_v6 = vld [vmem:[%s2085_s29 + $0x188] sm:$0xff]  ;;  %v1447_v7 = vld [vmem:[%s2085_s29 + $0x190] sm:$0xff] }
 0x200   : >> { %1444 = vst [vmem:[%s2081_s16 + $0x180] sm:$0xff] %v1443_v5  ;;  %1446 = vst [vmem:[%s2081_s16 + $0x188] sm:$0xff] %v1445_v6  ;;  %v1449_v8 = vld [vmem:[%s2085_s29 + $0x198] sm:$0xff]  ;;  %v1451_v9 = vld [vmem:[%s2085_s29 + $0x1a0] sm:$0xff] }
 0x201   : >> { %1448 = vst [vmem:[%s2081_s16 + $0x190] sm:$0xff] %v1447_v7  ;;  %v1453_v10 = vld [vmem:[%s2085_s29 + $0x1a8] sm:$0xff]  ;;  %1450 = vst [vmem:[%s2081_s16 + $0x198] sm:$0xff] %v1449_v8  ;;  %v1455_v11 = vld [vmem:[%s2085_s29 + $0x1b0] sm:$0xff]  ;;  %1343 = sbr.rel (!%p1340_p9) target bundleno = 487 (0x1e7), region = 132 }
 0x202   : >> { %1452 = vst [vmem:[%s2081_s16 + $0x1a0] sm:$0xff] %v1451_v9  ;;  %1454 = vst [vmem:[%s2081_s16 + $0x1a8] sm:$0xff] %v1453_v10  ;;  %v1457_v12 = vld [vmem:[%s2085_s29 + $0x1b8] sm:$0xff]  ;;  %v1459_v13 = vld [vmem:[%s2085_s29 + $0x1c0] sm:$0xff] }
 0x203   : >> { %1456 = vst [vmem:[%s2081_s16 + $0x1b0] sm:$0xff] %v1455_v11  ;;  %1458 = vst [vmem:[%s2081_s16 + $0x1b8] sm:$0xff] %v1457_v12  ;;  %v1461_v14 = vld [vmem:[%s2085_s29 + $0x1c8] sm:$0xff]  ;;  %v1463_v15 = vld [vmem:[%s2085_s29 + $0x1d0] sm:$0xff] }
 0x204   : >> { %1460 = vst [vmem:[%s2081_s16 + $0x1c0] sm:$0xff] %v1459_v13  ;;  %v1465_v16 = vld [vmem:[%s2085_s29 + $0x1d8] sm:$0xff]  ;;  %1462 = vst [vmem:[%s2081_s16 + $0x1c8] sm:$0xff] %v1461_v14  ;;  %v1467_v18 = vld [vmem:[%s2085_s29 + $0x1e0] sm:$0xff] }
 0x205   : >> { %1464 = vst [vmem:[%s2081_s16 + $0x1d0] sm:$0xff] %v1463_v15  ;;  %1466 = vst [vmem:[%s2081_s16 + $0x1d8] sm:$0xff] %v1465_v16  ;;  %v1469_v19 = vld [vmem:[%s2085_s29 + $0x1e8] sm:$0xff]  ;;  %v1471_v20 = vld [vmem:[%s2085_s29 + $0x1f0] sm:$0xff] }
 0x206   : >> { %1468 = vst [vmem:[%s2081_s16 + $0x1e0] sm:$0xff] %v1467_v18  ;;  %1470 = vst [vmem:[%s2081_s16 + $0x1e8] sm:$0xff] %v1469_v19  ;;  %v1473_v21 = vld [vmem:[%s2085_s29 + $0x1f8] sm:$0xff]  ;;  %s2796_s29 = smov %s2658_s11 }
 0x207   : >> { %1472 = vst [vmem:[%s2081_s16 + $0x1f0] sm:$0xff] %v1471_v20  ;;  %1474 = vst [vmem:[%s2081_s16 + $0x1f8] sm:$0xff] %v1473_v21  ;;  %s2795_s16 = smov %s2661_s12 }
 0x208 PF: > { %s2766_s18 = sand.u32 63, %s2805_s30   ;;  %s1737_s19 = sshll.u32 %s2591_s22, 9 }
 0x209   : > { %s1486_s23 = scalar_lea.vmem %s2388_s9, %s1737_s19 [#allocation4]   ;;  %s1488_s24 = scalar_lea.vmem %s2585_s15, %s1737_s19  }
 0x20a   : > { %p1728_p10 = scmp.le.s32.totalorder %s2766_s18, 0 }
 0x20b   : > { %s2095_s25 = smov (!%p1728_p10), %s1488_s24   ;;  %s2099_s26 = smov (!%p1728_p10), %s1486_s23  }
 0x20c   : > { %1587 = sbr.rel (%p1728_p10) target bundleno = 541 (0x21d), region = 137  ;;  %s2103_s5 = smov (!%p1728_p10), 0  }
 0x20d   : > { %s2107_s28 = smov (!%p1728_p10), 0  }
 0x213 LB: >> { %v1498_v17 = vld [vmem:[%s2101_s26] sm:$0xff]  ;;  %s1500_s30 = sadd.s32 1, %s2105_s5  ;;  %s1492_s28 = sadd.s32 1, %s2109_s28   ;;  %s2109_s28 = sphi %s2107_s28, %s1492_s28   ;;  %s2105_s5 = sphi %s2103_s5, %s2104_s5   ;;  %s2101_s26 = sphi %s2099_s26, %s1505_s26   ;;  %s2097_s25 = sphi %s2095_s25, %s1506_s25  }
 0x214   : >> { %1499 = vst [vmem:[%s2097_s25] sm:$0xff] %v1498_v17  ;;  %p1501_p12 = scmp.ge.s32.totalorder %s1500_s30, %s2766_s18  ;;  %p1491_p13 = scmp.ge.s32.totalorder %s1492_s28, %s2766_s18 }
 0x216   : >> { %s2809_s30 = smov (%p1501_p12, %s1500_s30), 0  ;;  %1494 = sbr.rel (!%p1491_p13) target bundleno = 531 (0x213), region = 143 }
 0x217   : >> { %s1729_s9 = sshll.u32 %s2809_s30, 3  ;;  %s2104_s5 = smov %s2809_s30  }
 0x218   : >> { %s1505_s26 = scalar_lea.vmem %s1486_s23, %s1729_s9 [#allocation4]   ;;  %s1506_s25 = scalar_lea.vmem %s1488_s24, %s1729_s9  }
 0x21d PF: > { %p13_p1 = scmp.ge.s32.totalorder %s2157_s17, 6   ;;  %s2798_s12 = smov %s2069_s13 }
 0x21e   : > { %s2799_s13 = smov %s2073_s14  ;;  %s2800_s14 = smov %s2167_s20 }
 0x21f   : > { %s2801_s15 = smov %s2157_s17  ;;  %15 = sbr.rel (!%p13_p1) target bundleno = 3 (0x3), region = 154 }
 0x226   :  { %1522 = vsyncpa [#allocation3], 1 }
 0x227   :  { %1524 = vsyncpa [#allocation3 + $0x1], 1 }

</bundles_post_ra>
